<compile_context>
chip_gen: v7x
topology: tpu7x:2x2x1
jax: 0.10.0
libtpu: 0.0.40
codegen_flags: <defaults>
</compile_context>

<pallas_src>
import math

import jax
import jax.numpy as jnp
from jax.experimental import pallas as pl
from jax.experimental.pallas import tpu as pltpu


def _round_up(x, m):
    return (x + m - 1) // m * m


def novel_angle_kernel(x_ref,
                       w1_ref, b1_ref,
                       w2_ref, b2_ref,
                       w3_ref, b3_ref,
                       w4_ref, b4_ref,
                       o_ref):
    x = x_ref[...]  # (TB, 2) f32

    # Layer 1 (in=2): a (TB,2)@(2,8) MXU push would be >98% padding and sits on
    # the serial dependency chain, so do it as two VPU broadcast FMAs instead.
    # w1/b1 are zero-padded to 128 lanes, so this is a full-lane vreg op and
    # the padded lanes come out as tanh(0) == 0.
    h = x[:, 0:1] * w1_ref[0:1, :] + x[:, 1:2] * w1_ref[1:2, :] + b1_ref[...]
    h = jnp.tanh(h)

    # Layers 2-4 on the MXU with f32 accumulation. Operands are zero-padded to
    # K = N = 128 so every intermediate, bias add and the output store are
    # lane-dense (unmasked vst); padding adds no MXU pushes since K,N <= 128
    # already map to a single (padded) MXU tile.
    h = jnp.dot(h, w2_ref[...], preferred_element_type=jnp.float32) + b2_ref[...]
    h = jnp.tanh(h)
    h = jnp.dot(h, w3_ref[...], preferred_element_type=jnp.float32) + b3_ref[...]
    h = jnp.tanh(h)
    h = jnp.dot(h, w4_ref[...], preferred_element_type=jnp.float32) + b4_ref[...]

    o_ref[...] = h.astype(o_ref.dtype)


def prepare_params(params):
    """Zero-pad weights/biases so every layer is 128 lanes wide.

    Mathematically a no-op: zero weight rows/cols contribute nothing and the
    zero-padded bias lanes give tanh(0) == 0 in the hidden activations.
    """
    def pad_to(a, shape):
        return jnp.pad(a, [(0, t - s) for s, t in zip(a.shape, shape)])

    return dict(
        w1=pad_to(params["w1"], (2, 128)),    # (2, 8)    -> (2, 128)
        b1=pad_to(params["b1"], (1, 128)),    # (1, 8)    -> (1, 128)
        w2=pad_to(params["w2"], (128, 128)),  # (8, 32)   -> (128, 128)
        b2=pad_to(params["b2"], (1, 128)),    # (1, 32)   -> (1, 128)
        w3=pad_to(params["w3"], (128, 128)),  # (32, 128) -> (128, 128)
        b3=params["b3"],                      # (1, 128)
        w4=params["w4"],                      # (128, 128)
        b4=params["b4"],                      # (1, 128)
    )


def novel_angle_forward(x, padded_params, *, tile_b=4096):
    """x: (B, 2) float32; padded_params: output of prepare_params(). -> (B, 128)."""
    B = x.shape[0]
    p = padded_params

    # Batch tile: multiple of 8 (sublane granule), capped at ceil(B/2) so there
    # are >= 2 grid steps whenever possible (both v7x TensorCores get work).
    # Default 4096 keeps the ~0.35 us per-grid-step overhead at a few percent
    # of the per-step MXU+EUP work.
    tb = max(8, min(_round_up(tile_b, 8), _round_up(pl.cdiv(B, 2), 8)))
    grid = (pl.cdiv(B, tb),)

    # Scoped-VMEM budget: double-buffered (tb,2) input block (lane-padded to
    # 128), double-buffered (tb,128) output block, ~6 live f32 (tb,128)
    # intermediates, plus weights/biases; x2 safety margin, clamped to
    # [32 MiB, 48 MiB] (v5e/v6e have 128 MiB physical, v7x 64 MiB per core).
    blk_bytes = tb * 128 * 4
    vmem_limit = int(min(48 * 2**20,
                         max(32 * 2**20, 2 * (10 * blk_bytes + (1 << 19)))))

    # Advisory cost so XLA can overlap surrounding ops with the custom call.
    param_bytes = sum(int(a.size) * 4 for a in p.values())
    cost = pl.CostEstimate(
        flops=2 * B * 128 * (2 + 3 * 128),
        transcendentals=3 * B * 128,
        bytes_accessed=B * 2 * 4 + B * 128 * 4 + param_bytes,
    )

    # Weights/biases: constant index_map -> fetched once, resident in VMEM
    # across all grid steps (their ~0.4 MiB double-buffer cost is negligible).
    const = lambda a: pl.BlockSpec(a.shape, lambda i: (0,) * a.ndim)

    return pl.pallas_call(
        novel_angle_kernel,
        out_shape=jax.ShapeDtypeStruct((B, 128), jnp.float32),
        grid=grid,
        in_specs=[pl.BlockSpec((tb, 2), lambda i: (i, 0)),
                  const(p["w1"]), const(p["b1"]),
                  const(p["w2"]), const(p["b2"]),
                  const(p["w3"]), const(p["b3"]),
                  const(p["w4"]), const(p["b4"])],
        out_specs=pl.BlockSpec((tb, 128), lambda i: (i, 0)),
        compiler_params=pltpu.CompilerParams(
            dimension_semantics=("parallel",),
            vmem_limit_bytes=vmem_limit),
        cost_estimate=cost,
    )(x, p["w1"], p["b1"], p["w2"], p["b2"], p["w3"], p["b3"], p["w4"], p["b4"])


# jit the wrapper so the pallas_call fuses into the surrounding XLA program.
novel_angle_forward_jit = jax.jit(novel_angle_forward, static_argnames=("tile_b",))


def init_params(key):
    """Deterministic init mirroring nn.Linear default (U(-1/sqrt(fan_in), +))."""
    dims = [(2, 8), (8, 32), (32, 128), (128, 128)]
    params = {}
    for i, (fan_in, fan_out) in enumerate(dims, start=1):
        key, kw, kb = jax.random.split(key, 3)
        bound = 1.0 / math.sqrt(fan_in)
        # stored as (in, out) so the kernel computes x @ W
        params[f"w{i}"] = jax.random.uniform(
            kw, (fan_in, fan_out), jnp.float32, -bound, bound)
        # bias kept 2D (1, out) for clean TPU layout / broadcasting
        params[f"b{i}"] = jax.random.uniform(
            kb, (1, fan_out), jnp.float32, -bound, bound)
    return params


def reference_forward(x, params):
    h = jnp.tanh(x @ params["w1"] + params["b1"])
    h = jnp.tanh(h @ params["w2"] + params["b2"])
    h = jnp.tanh(h @ params["w3"] + params["b3"])
    return h @ params["w4"] + params["b4"]


if __name__ == "__main__":
    key = jax.random.PRNGKey(0)
    key, kx1, kx2 = jax.random.split(key, 3)

    params = init_params(key)
    padded = prepare_params(params)

    # Small-batch check (single grid step).
    B = 8
    x = jax.random.normal(kx1, (B, 2), jnp.float32)
    out = jax.block_until_ready(novel_angle_forward_jit(x, padded))
    ref = reference_forward(x, params)
    assert out.shape == (B, 128), out.shape
    assert jnp.allclose(out, ref, atol=1e-5, rtol=1e-5), "mismatch vs reference (B=8)"

    # Multi-step grid + non-divisible trailing block (masked writeback path).
    B2 = 40
    x2 = jax.random.normal(kx2, (B2, 2), jnp.float32)
    out2 = jax.block_until_ready(novel_angle_forward_jit(x2, padded, tile_b=16))
    ref2 = reference_forward(x2, params)
    assert out2.shape == (B2, 128), out2.shape
    assert jnp.allclose(out2, ref2, atol=1e-5, rtol=1e-5), "mismatch vs reference (B=40)"

    print("KERNEL_OK")
</pallas_src>

<mosaic_0001>
module attributes {stable_mosaic.version = 11 : i64} {
  func.func @novel_angle_kernel(%arg0: i32, %arg1: memref<8x2xf32, #tpu.memory_space<vmem>>, %arg2: memref<2x128xf32, #tpu.memory_space<vmem>>, %arg3: memref<1x128xf32, #tpu.memory_space<vmem>>, %arg4: memref<128x128xf32, #tpu.memory_space<vmem>>, %arg5: memref<1x128xf32, #tpu.memory_space<vmem>>, %arg6: memref<128x128xf32, #tpu.memory_space<vmem>>, %arg7: memref<1x128xf32, #tpu.memory_space<vmem>>, %arg8: memref<128x128xf32, #tpu.memory_space<vmem>>, %arg9: memref<1x128xf32, #tpu.memory_space<vmem>>, %arg10: memref<8x128xf32, #tpu.memory_space<vmem>>) attributes {dimension_semantics = [#tpu.dimension_semantics<parallel>], iteration_bounds = array<i64: 1>, scalar_prefetch = 0 : i64, scratch_operands = 0 : i64, tpu.core_type = #tpu.core_type<tc>, window_params = [{transform_indices = @transform_0, window_bounds = array<i64: 8, 2>}, {pipeline_mode = #tpu.pipeline_mode<synchronous>, transform_indices = @transform_1, window_bounds = array<i64: 2, 128>}, {pipeline_mode = #tpu.pipeline_mode<synchronous>, transform_indices = @transform_2, window_bounds = array<i64: 1, 128>}, {pipeline_mode = #tpu.pipeline_mode<synchronous>, transform_indices = @transform_3, window_bounds = array<i64: 128, 128>}, {pipeline_mode = #tpu.pipeline_mode<synchronous>, transform_indices = @transform_4, window_bounds = array<i64: 1, 128>}, {pipeline_mode = #tpu.pipeline_mode<synchronous>, transform_indices = @transform_5, window_bounds = array<i64: 128, 128>}, {pipeline_mode = #tpu.pipeline_mode<synchronous>, transform_indices = @transform_6, window_bounds = array<i64: 1, 128>}, {pipeline_mode = #tpu.pipeline_mode<synchronous>, transform_indices = @transform_7, window_bounds = array<i64: 128, 128>}, {pipeline_mode = #tpu.pipeline_mode<synchronous>, transform_indices = @transform_8, window_bounds = array<i64: 1, 128>}, {transform_indices = @transform_9, window_bounds = array<i64: 8, 128>}]} {
    %c0 = arith.constant 0 : index
    %c0_0 = arith.constant 0 : index
    %0 = vector.load %arg1[%c0, %c0_0] : memref<8x2xf32, #tpu.memory_space<vmem>>, vector<8x2xf32>
    %1 = vector.extract_strided_slice %0 {offsets = [0, 0], sizes = [8, 1], strides = [1, 1]} : vector<8x2xf32> to vector<8x1xf32>
    %c0_1 = arith.constant 0 : index
    %c0_2 = arith.constant 0 : index
    %2 = vector.load %arg2[%c0_1, %c0_2] : memref<2x128xf32, #tpu.memory_space<vmem>>, vector<1x128xf32>
    %3 = vector.broadcast %1 : vector<8x1xf32> to vector<8x128xf32>
    %4 = vector.broadcast %2 : vector<1x128xf32> to vector<8x128xf32>
    %5 = arith.mulf %3, %4 : vector<8x128xf32>
    %6 = vector.extract_strided_slice %0 {offsets = [0, 1], sizes = [8, 1], strides = [1, 1]} : vector<8x2xf32> to vector<8x1xf32>
    %c1 = arith.constant 1 : index
    %c0_3 = arith.constant 0 : index
    %7 = vector.load %arg2[%c1, %c0_3] : memref<2x128xf32, #tpu.memory_space<vmem>>, vector<1x128xf32>
    %8 = vector.broadcast %6 : vector<8x1xf32> to vector<8x128xf32>
    %9 = vector.broadcast %7 : vector<1x128xf32> to vector<8x128xf32>
    %10 = arith.mulf %8, %9 : vector<8x128xf32>
    %11 = arith.addf %5, %10 : vector<8x128xf32>
    %c0_4 = arith.constant 0 : index
    %c0_5 = arith.constant 0 : index
    %12 = vector.load %arg3[%c0_4, %c0_5] : memref<1x128xf32, #tpu.memory_space<vmem>>, vector<1x128xf32>
    %13 = vector.broadcast %12 : vector<1x128xf32> to vector<8x128xf32>
    %14 = arith.addf %11, %13 : vector<8x128xf32>
    %15 = math.tanh %14 : vector<8x128xf32>
    %c0_6 = arith.constant 0 : index
    %c0_7 = arith.constant 0 : index
    %16 = vector.load %arg4[%c0_6, %c0_7] : memref<128x128xf32, #tpu.memory_space<vmem>>, vector<128x128xf32>
    %cst = arith.constant dense<0.000000e+00> : vector<8x128xf32>
    %17 = tpu.matmul %15, %16, %cst {dimension_numbers = #tpu.dot_dimension_numbers<[1], [0], [0], [1], [0, 0, 1, 1], [], []>} : vector<8x128xf32>, vector<128x128xf32>, vector<8x128xf32> -> vector<8x128xf32>
    %c0_8 = arith.constant 0 : index
    %c0_9 = arith.constant 0 : index
    %18 = vector.load %arg5[%c0_8, %c0_9] : memref<1x128xf32, #tpu.memory_space<vmem>>, vector<1x128xf32>
    %19 = vector.broadcast %18 : vector<1x128xf32> to vector<8x128xf32>
    %20 = arith.addf %17, %19 : vector<8x128xf32>
    %21 = math.tanh %20 : vector<8x128xf32>
    %c0_10 = arith.constant 0 : index
    %c0_11 = arith.constant 0 : index
    %22 = vector.load %arg6[%c0_10, %c0_11] : memref<128x128xf32, #tpu.memory_space<vmem>>, vector<128x128xf32>
    %cst_12 = arith.constant dense<0.000000e+00> : vector<8x128xf32>
    %23 = tpu.matmul %21, %22, %cst_12 {dimension_numbers = #tpu.dot_dimension_numbers<[1], [0], [0], [1], [0, 0, 1, 1], [], []>} : vector<8x128xf32>, vector<128x128xf32>, vector<8x128xf32> -> vector<8x128xf32>
    %c0_13 = arith.constant 0 : index
    %c0_14 = arith.constant 0 : index
    %24 = vector.load %arg7[%c0_13, %c0_14] : memref<1x128xf32, #tpu.memory_space<vmem>>, vector<1x128xf32>
    %25 = vector.broadcast %24 : vector<1x128xf32> to vector<8x128xf32>
    %26 = arith.addf %23, %25 : vector<8x128xf32>
    %27 = math.tanh %26 : vector<8x128xf32>
    %c0_15 = arith.constant 0 : index
    %c0_16 = arith.constant 0 : index
    %28 = vector.load %arg8[%c0_15, %c0_16] : memref<128x128xf32, #tpu.memory_space<vmem>>, vector<128x128xf32>
    %cst_17 = arith.constant dense<0.000000e+00> : vector<8x128xf32>
    %29 = tpu.matmul %27, %28, %cst_17 {dimension_numbers = #tpu.dot_dimension_numbers<[1], [0], [0], [1], [0, 0, 1, 1], [], []>} : vector<8x128xf32>, vector<128x128xf32>, vector<8x128xf32> -> vector<8x128xf32>
    %c0_18 = arith.constant 0 : index
    %c0_19 = arith.constant 0 : index
    %30 = vector.load %arg9[%c0_18, %c0_19] : memref<1x128xf32, #tpu.memory_space<vmem>>, vector<1x128xf32>
    %31 = vector.broadcast %30 : vector<1x128xf32> to vector<8x128xf32>
    %32 = arith.addf %29, %31 : vector<8x128xf32>
    %c0_20 = arith.constant 0 : index
    %c0_21 = arith.constant 0 : index
    %33 = vector.load %arg10[%c0_20, %c0_21] : memref<8x128xf32, #tpu.memory_space<vmem>>, vector<8x128xf32>
    tpu.vector_store %arg10[%c0_20, %c0_21], %32 {strides = array<i32>} : memref<8x128xf32, #tpu.memory_space<vmem>>, vector<8x128xf32>,
    return
  }
  func.func @transform_0(%arg0: i32) -> (i32, i32) {
    %c0_i32 = arith.constant 0 : i32
    %c0_i32_0 = arith.constant 0 : i32
    return %arg0, %c0_i32 : i32, i32
  }
  func.func @transform_1(%arg0: i32) -> (i32, i32) {
    %c0_i32 = arith.constant 0 : i32
    %c0_i32_0 = arith.constant 0 : i32
    %c0_i32_1 = arith.constant 0 : i32
    return %c0_i32, %c0_i32_0 : i32, i32
  }
  func.func @transform_2(%arg0: i32) -> (i32, i32) {
    %c0_i32 = arith.constant 0 : i32
    %c0_i32_0 = arith.constant 0 : i32
    %c0_i32_1 = arith.constant 0 : i32
    return %c0_i32, %c0_i32_0 : i32, i32
  }
  func.func @transform_3(%arg0: i32) -> (i32, i32) {
    %c0_i32 = arith.constant 0 : i32
    %c0_i32_0 = arith.constant 0 : i32
    %c0_i32_1 = arith.constant 0 : i32
    return %c0_i32, %c0_i32_0 : i32, i32
  }
  func.func @transform_4(%arg0: i32) -> (i32, i32) {
    %c0_i32 = arith.constant 0 : i32
    %c0_i32_0 = arith.constant 0 : i32
    %c0_i32_1 = arith.constant 0 : i32
    return %c0_i32, %c0_i32_0 : i32, i32
  }
  func.func @transform_5(%arg0: i32) -> (i32, i32) {
    %c0_i32 = arith.constant 0 : i32
    %c0_i32_0 = arith.constant 0 : i32
    %c0_i32_1 = arith.constant 0 : i32
    return %c0_i32, %c0_i32_0 : i32, i32
  }
  func.func @transform_6(%arg0: i32) -> (i32, i32) {
    %c0_i32 = arith.constant 0 : i32
    %c0_i32_0 = arith.constant 0 : i32
    %c0_i32_1 = arith.constant 0 : i32
    return %c0_i32, %c0_i32_0 : i32, i32
  }
  func.func @transform_7(%arg0: i32) -> (i32, i32) {
    %c0_i32 = arith.constant 0 : i32
    %c0_i32_0 = arith.constant 0 : i32
    %c0_i32_1 = arith.constant 0 : i32
    return %c0_i32, %c0_i32_0 : i32, i32
  }
  func.func @transform_8(%arg0: i32) -> (i32, i32) {
    %c0_i32 = arith.constant 0 : i32
    %c0_i32_0 = arith.constant 0 : i32
    %c0_i32_1 = arith.constant 0 : i32
    return %c0_i32, %c0_i32_0 : i32, i32
  }
  func.func @transform_9(%arg0: i32) -> (i32, i32) {
    %c0_i32 = arith.constant 0 : i32
    %c0_i32_0 = arith.constant 0 : i32
    return %arg0, %c0_i32 : i32, i32
  }
}

</mosaic_0001>

<bundles_post_ra>
// kernel: novel_angle_forward.1
= control target key start
LH: loop header
LB: loop body
LE: loop exit
PB: predicated region body
PF: predicated region fallthrough
CT: control target
= control target key end

     0   :  { %14 = vsyncpa [#allocation3], 0  ;;  %s924_s0 = inlined_call_operand.vmem [shape: f32[8,2], index: 0, kind: input, shape index: {}]   ;;  %s925_s1 = inlined_call_operand.vmem [shape: f32[2,128], index: 1, kind: input, shape index: {}]   ;;  %s926_s2 = inlined_call_operand.vmem [shape: f32[1,128], index: 2, kind: input, shape index: {}]   ;;  %s927_s3 = inlined_call_operand.hbm [shape: f32[128,128], index: 3, kind: input, shape index: {}]   ;;  %s928_s4 = inlined_call_operand.vmem [shape: f32[1,128], index: 4, kind: input, shape index: {}]   ;;  %s929_s5 = inlined_call_operand.hbm [shape: f32[128,128], index: 5, kind: input, shape index: {}]   ;;  %s930_s6 = inlined_call_operand.vmem [shape: f32[1,128], index: 6, kind: input, shape index: {}]   ;;  %s931_s7 = inlined_call_operand.hbm [shape: f32[128,128], index: 7, kind: input, shape index: {}]   ;;  %s932_s8 = inlined_call_operand.vmem [shape: f32[1,128], index: 8, kind: input, shape index: {}]   ;;  %s933_s9 = inlined_call_operand.hbm [shape: f32[8,128], index: 9, kind: output, shape index: {}]  }
   0x1   :  { %15 = vsyncpa [#allocation6], 0 }
   0x2   :  { %16 = vsyncpa [#allocation4], 0  ;;  %s751_s30 = smov [#allocation5]   ;;  %s752_s11 = smov [#allocation2]  }
   0x3   :  { %s42_s10 = sshll.u32 %s751_s30, 4  ;;  %s28_s12 = sshll.u32 %s752_s11, 4  ;;  %s43_s10 = int_to_ptr.vmem [resolvable:$true] %s42_s10  ;;  %s812_s12 = int_to_ptr.vmem [resolvable:$true] %s28_s12 }
   0x4   :  { %s657_s15 = scalar_lea.hbm %s929_s5, 2048 }
   0x5   :  { %p658_p0 = scmp.ne.s32.totalorder %s929_s5, %s657_s15  ;;  %p661_p1 = scmp.lt.u32.totalorder %s657_s15, %s929_s5 }
   0x7   :  { %p663_p2 = pnand %p661_p1, %p658_p0 }
   0x9   :  { %666 = shalt.err (!%p663_p2)
}
   0xa   :  { %s667_s20 = scalar_lea.vmem %s43_s10, 2048  ;;  %p672_p4 = scmp.lt.s32.totalorder %s43_s10, %s43_s10 }
   0xb   :  { %p668_p3 = scmp.ne.s32.totalorder %s43_s10, %s667_s20  ;;  %p673_p5 = scmp.lt.s32.totalorder %s667_s20, %s667_s20 }
   0xd   :  { %p674_p6 = por %p673_p5, %p672_p4 }
   0xf   :  { %p675_p7 = pnand %p674_p6, %p668_p3 }
  0x11   :  { %678 = shalt.err (!%p675_p7)
}
  0x12   :  { %s753_s21 = smov 128   ;;  %s754_s22 = smov 8  }
  0x13   :  { %48 = dma.hbm_to_vmem [thread:$0]  %s929_s5, 2048, %s43_s10, [#allocation6], %s753_s21, %s753_s21, %s754_s22  }
  0x14   :  { %s679_s27 = scalar_lea.hbm %s927_s3, 2048 }
  0x15   :  { %p680_p8 = scmp.ne.s32.totalorder %s927_s3, %s679_s27  ;;  %p683_p9 = scmp.lt.u32.totalorder %s679_s27, %s927_s3 }
  0x17   :  { %p685_p10 = pnand %p683_p9, %p680_p8 }
  0x19   :  { %688 = shalt.err (!%p685_p10)
}
  0x1a   :  { %s689_s13 = scalar_lea.vmem %s812_s12, 2048  ;;  %p694_p12 = scmp.lt.s32.totalorder %s812_s12, %s812_s12 }
  0x1b   :  { %p690_p11 = scmp.ne.s32.totalorder %s812_s12, %s689_s13  ;;  %p695_p13 = scmp.lt.s32.totalorder %s689_s13, %s689_s13 }
  0x1d   :  { %p696_p0 = por %p695_p13, %p694_p12 }
  0x1f   :  { %p697_p1 = pnand %p696_p0, %p690_p11 }
  0x21   :  { %700 = shalt.err (!%p697_p1)
}
  0x22   :  { %34 = dma.hbm_to_vmem [thread:$0]  %s927_s3, 2048, %s812_s12, [#allocation3], %s753_s21, %s753_s21, %s754_s22  }
  0x23   :  { %s755_s14 = smov [#allocation7]   ;;  %s701_s18 = scalar_lea.hbm %s931_s7, 2048 }
  0x24   :  { %s56_s15 = sshll.u32 %s755_s14, 4  ;;  %p702_p2 = scmp.ne.s32.totalorder %s931_s7, %s701_s18  ;;  %s57_s15 = int_to_ptr.vmem [resolvable:$true] %s56_s15 }
  0x25   :  { %p705_p3 = scmp.lt.u32.totalorder %s701_s18, %s931_s7 }
  0x27   :  { %p707_p4 = pnand %p705_p3, %p702_p2 }
  0x29   :  { %710 = shalt.err (!%p707_p4)
}
  0x2a   :  { %s711_s25 = scalar_lea.vmem %s57_s15, 2048  ;;  %p716_p6 = scmp.lt.s32.totalorder %s57_s15, %s57_s15 }
  0x2b   :  { %p712_p5 = scmp.ne.s32.totalorder %s57_s15, %s711_s25  ;;  %p717_p7 = scmp.lt.s32.totalorder %s711_s25, %s711_s25 }
  0x2d   :  { %p718_p8 = por %p717_p7, %p716_p6 }
  0x2f   :  { %p719_p9 = pnand %p718_p8, %p712_p5 }
  0x31   :  { %722 = shalt.err (!%p719_p9)
}
  0x32   :  { %62 = dma.hbm_to_vmem [thread:$0]  %s931_s7, 2048, %s57_s15, [#allocation6], %s753_s21, %s753_s21, %s754_s22  }
  0x33   :  { %745 = dma.done.wait [#allocation3], 2048  }
  0x34   :  { %746 = vsyncadd [#allocation3], 4294965248 }
  0x35   :  { %747 = dma.done.wait [#allocation6], 4096  }
  0x36   :  { %748 = vsyncadd [#allocation6], 4294963200  ;;  %v756_v0 = vmov 0   ;;  %v757_v1 = vmov 0.0|0.0   ;;  %v74_v2 = vld [vmem:[%s924_s0] sm:$0xff]  ;;  %v106_v3 = vld [vmem:[#allocation2] sm:$0xff] }
  0x37   :  { %649 = vset.pattern.permute.xlu0 %v756_v0  ;;  %566 = vmatprep.subr.bf16.mxu0 %v757_v1  ;;  %v107_v4 = vld [vmem:[#allocation2 + $0x8] sm:$0xff]  ;;  %v108_v6 = vld [vmem:[#allocation2 + $0x10] sm:$0xff]  ;;  %v109_v7 = vld [vmem:[#allocation2 + $0x18] sm:$0xff]  ;;  %v758_v11 = vmov 1   ;;  %vm759_vm0 = vmmov 0   ;;  %v760_v18 = vmov 0.0  }
  0x38   :  { %590 = vmatprep.subr.bf16.mxu1 %v757_v1  ;;  %78 = vperm.xlu0 %649, %v74_v2   ;;  %v567_v5 = vpack.c.bf16 %v107_v4, %v106_v3  ;;  %v570_v8 = vpack.c.bf16 %v109_v7, %v108_v6  ;;  %v110_v9 = vld [vmem:[#allocation2 + $0x20] sm:$0xff]  ;;  %v111_v10 = vld [vmem:[#allocation2 + $0x28] sm:$0xff]  ;;  %v112_v13 = vld [vmem:[#allocation2 + $0x30] sm:$0xff]  ;;  %s761_s5 = smov [#allocation8]  }
  0x39   :  { %v573_v12 = vpack.c.bf16 %v111_v10, %v110_v9  ;;  %v113_v14 = vld [vmem:[#allocation2 + $0x38] sm:$0xff]  ;;  %v114_v16 = vld [vmem:[#allocation2 + $0x40] sm:$0xff]  ;;  %v115_v17 = vld [vmem:[#allocation2 + $0x48] sm:$0xff]  ;;  %493 = vmatprep.mubr.msk.f32.mxu0 %vm759_vm0, %v760_v18  ;;  %528 = vmatprep.mubr.msk.f32.mxu1 %vm759_vm0, %v760_v18  ;;  %s394_s10 = sshll.u32 %s761_s5, 4  ;;  %s395_s10 = int_to_ptr.vmem [resolvable:$true] %s394_s10 }
  0x3a   :  { %568 = vmatpush3.bf16.msra.mxu0 %v567_v5  ;;  %v576_v15 = vpack.c.bf16 %v113_v14, %v112_v13  ;;  %v579_v19 = vpack.c.bf16 %v115_v17, %v114_v16  ;;  %v116_v20 = vld [vmem:[#allocation2 + $0x50] sm:$0xff]  ;;  %v117_v21 = vld [vmem:[#allocation2 + $0x58] sm:$0xff]  ;;  %v118_v23 = vld [vmem:[#allocation2 + $0x60] sm:$0xff]  ;;  %s723_s14 = scalar_lea.vmem %s395_s10, 128  ;;  %p728_p11 = scmp.lt.s32.totalorder %s395_s10, %s395_s10 }
  0x3b   :  { %569 = vmatprep.subr.bf16.mxu0 %v757_v1  ;;  %v582_v22 = vpack.c.bf16 %v117_v21, %v116_v20  ;;  %v119_v24 = vld [vmem:[#allocation2 + $0x68] sm:$0xff]  ;;  %v200_v26 = vld [vmem:[#allocation5] sm:$0xff]  ;;  %v202_v28 = vld [vmem:[#allocation5 + $0x10] sm:$0xff]  ;;  %p724_p10 = scmp.ne.s32.totalorder %s395_s10, %s723_s14  ;;  %p729_p12 = scmp.lt.s32.totalorder %s723_s14, %s723_s14 }
  0x3c   :  { %650 = vset.pattern.permute.xlu0 %v758_v11  ;;  %v585_v25 = vpack.c.bf16 %v119_v24, %v118_v23  ;;  %v201_v27 = vld [vmem:[#allocation5 + $0x8] sm:$0xff]  ;;  %v120_v29 = vld [vmem:[#allocation2 + $0x70] sm:$0xff]  ;;  %v121_v30 = vld [vmem:[#allocation2 + $0x78] sm:$0xff] }
  0x3d   :  { %88 = vperm.xlu0 %650, %v74_v2   ;;  %v591_v31 = vpack.c.bf16 %v201_v27, %v200_v26  ;;  %v203_v32 = vld [vmem:[#allocation5 + $0x18] sm:$0xff]  ;;  %v588_v34 = vpack.c.bf16 %v121_v30, %v120_v29  ;;  %v204_v35 = vld [vmem:[#allocation5 + $0x20] sm:$0xff]  ;;  %v205_v36 = vld [vmem:[#allocation5 + $0x28] sm:$0xff]  ;;  %p730_p13 = por %p729_p12, %p728_p11 }
  0x3e   :  { %571 = vmatpush3.bf16.msra.mxu0 %v570_v8  ;;  %v594_v33 = vpack.c.bf16 %v203_v32, %v202_v28  ;;  %v597_v37 = vpack.c.bf16 %v205_v36, %v204_v35  ;;  %v206_v38 = vld [vmem:[#allocation5 + $0x30] sm:$0xff]  ;;  %v207_v39 = vld [vmem:[#allocation5 + $0x38] sm:$0xff]  ;;  %v208_v41 = vld [vmem:[#allocation5 + $0x40] sm:$0xff] }
  0x3f   :  { %572 = vmatprep.subr.bf16.mxu0 %v757_v1  ;;  %592 = vmatpush3.bf16.msra.mxu1 %v591_v31  ;;  %v600_v40 = vpack.c.bf16 %v207_v39, %v206_v38  ;;  %v209_v42 = vld [vmem:[#allocation5 + $0x48] sm:$0xff]  ;;  %v404_v45 = vld [vmem:[%s925_s1] ss:$0 sm:$0xff]  ;;  %v405_v46 = vld [vmem:[%s925_s1 + $0x1] ss:$0 sm:$0xff]  ;;  %p731_p0 = pnand %p730_p13, %p724_p10 }
  0x40   :  { %593 = vmatprep.subr.bf16.mxu1 %v757_v1  ;;  %v603_v43 = vpack.c.bf16 %v209_v42, %v208_v41  ;;  %v406_v50 = vld [vmem:[%s926_s2] ss:$0 sm:$0xff]  ;;  %v211_v55 = vld [vmem:[#allocation5 + $0x58] sm:$0xff]  ;;  %v212_v57 = vld [vmem:[#allocation5 + $0x60] sm:$0xff] }
  0x41   :  { %v210_v54 = vld [vmem:[#allocation5 + $0x50] sm:$0xff]  ;;  %v213_v58 = vld [vmem:[#allocation5 + $0x68] sm:$0xff]  ;;  %v215_v61 = vld [vmem:[#allocation5 + $0x78] sm:$0xff] }
  0x42   :  { %574 = vmatpush3.bf16.msra.mxu0 %v573_v12  ;;  %v606_v56 = vpack.c.bf16 %v211_v55, %v210_v54  ;;  %v609_v59 = vpack.c.bf16 %v213_v58, %v212_v57  ;;  %v214_v60 = vld [vmem:[#allocation5 + $0x70] sm:$0xff]  ;;  %v294_v63 = vld [vmem:[#allocation7] sm:$0xff]  ;;  %v295_v0 = vld [vmem:[#allocation7 + $0x8] sm:$0xff] }
  0x43   :  { %575 = vmatprep.subr.bf16.mxu0 %v757_v1  ;;  %595 = vmatpush3.bf16.msra.mxu1 %v594_v33  ;;  %v612_v62 = vpack.c.bf16 %v215_v61, %v214_v60  ;;  %v296_v2 = vld [vmem:[#allocation7 + $0x10] sm:$0xff]  ;;  %v615_v3 = vpack.c.bf16 %v295_v0, %v294_v63  ;;  %v297_v4 = vld [vmem:[#allocation7 + $0x18] sm:$0xff]  ;;  %v298_v6 = vld [vmem:[#allocation7 + $0x20] sm:$0xff] }
  0x44   :  { %596 = vmatprep.subr.bf16.mxu1 %v757_v1  ;;  %v618_v5 = vpack.c.bf16 %v297_v4, %v296_v2  ;;  %v299_v7 = vld [vmem:[#allocation7 + $0x28] sm:$0xff]  ;;  %v300_v9 = vld [vmem:[#allocation7 + $0x30] sm:$0xff]  ;;  %v301_v10 = vld [vmem:[#allocation7 + $0x38] sm:$0xff] }
  0x45   :  { %v621_v8 = vpack.c.bf16 %v299_v7, %v298_v6  ;;  %v624_v11 = vpack.c.bf16 %v301_v10, %v300_v9  ;;  %v302_v12 = vld [vmem:[#allocation7 + $0x40] sm:$0xff]  ;;  %v303_v13 = vld [vmem:[#allocation7 + $0x48] sm:$0xff]  ;;  %v304_v20 = vld [vmem:[#allocation7 + $0x50] sm:$0xff] }
  0x46   :  { %577 = vmatpush3.bf16.msra.mxu0 %v576_v15  ;;  %v627_v14 = vpack.c.bf16 %v303_v13, %v302_v12  ;;  %v407_v15 = vld [vmem:[%s928_s4] ss:$0 sm:$0xff]  ;;  %v305_v21 = vld [vmem:[#allocation7 + $0x58] sm:$0xff]  ;;  %v306_v23 = vld [vmem:[#allocation7 + $0x60] sm:$0xff] }
  0x47   :  { %578 = vmatprep.subr.bf16.mxu0 %v757_v1  ;;  %598 = vmatpush3.bf16.msra.mxu1 %v597_v37  ;;  %v307_v24 = vld [vmem:[#allocation7 + $0x68] sm:$0xff]  ;;  %v308_v26 = vld [vmem:[#allocation7 + $0x70] sm:$0xff]  ;;  %v309_v27 = vld [vmem:[#allocation7 + $0x78] sm:$0xff] }
  0x48   :  { %599 = vmatprep.subr.bf16.mxu1 %v757_v1  ;;  %v636_v28 = vpack.c.bf16 %v309_v27, %v308_v26  ;;  %v408_v29 = vld [vmem:[%s930_s6] ss:$0 sm:$0xff] }
  0x4a   :  { %580 = vmatpush3.bf16.msra.mxu0 %v579_v19 }
  0x4b   :  { %581 = vmatprep.subr.bf16.mxu0 %v757_v1  ;;  %601 = vmatpush3.bf16.msra.mxu1 %v600_v40 }
  0x4c   :  { %602 = vmatprep.subr.bf16.mxu1 %v757_v1 }
  0x4e   :  { %583 = vmatpush3.bf16.msra.mxu0 %v582_v22  ;;  %v630_v22 = vpack.c.bf16 %v305_v21, %v304_v20 }
  0x4f   :  { %584 = vmatprep.subr.bf16.mxu0 %v757_v1  ;;  %604 = vmatpush3.bf16.msra.mxu1 %v603_v43 }
  0x50   :  { %605 = vmatprep.subr.bf16.mxu1 %v757_v1 }
  0x52   :  { %586 = vmatpush3.bf16.msra.mxu0 %v585_v25  ;;  %v633_v25 = vpack.c.bf16 %v307_v24, %v306_v23 }
  0x53   :  { %587 = vmatprep.subr.bf16.mxu0 %v757_v1  ;;  %607 = vmatpush3.bf16.msra.mxu1 %v606_v56 }
  0x54   :  { %608 = vmatprep.subr.bf16.mxu1 %v757_v1 }
  0x56   :  { %589 = vmatpush3.bf16.msra.mxu0 %v588_v34  ;;  %v409_v34 = vld [vmem:[%s932_s8] ss:$0 sm:$0xff] }
  0x57   :  { %614 = vmatprep.subr.bf16.mxu0 %v757_v1  ;;  %610 = vmatpush3.bf16.msra.mxu1 %v609_v59 }
  0x58   :  { %611 = vmatprep.subr.bf16.mxu1 %v757_v1 }
  0x5b   :  { %613 = vmatpush3.bf16.msra.mxu1 %v612_v62 }
  0xb7   :  { %v79_v44 = vpop.permute.xlu0 %78 }
  0xb8   :  { %v85_v48 = vmul.f32 %v404_v45, %v79_v44 }
  0xbc   :  { %v89_v47 = vpop.permute.xlu0 %88 }
  0xbd   :  { %v95_v49 = vmul.f32 %v405_v46, %v89_v47 }
  0xbf   :  { %v96_v51 = vadd.f32 %v95_v49, %v85_v48 }
  0xc1   :  { %v104_v52 = vadd.f32 %v406_v50, %v96_v51 }
  0xc3   :  { %651 = vtanh.f32 %v104_v52 }
  0xcd   :  { %v652_v53 = vpop.eup %651 }
  0xce   :  { %494 = vmatmul.mubr.f32.vlgmr.msra.gmra.mrb[0].mxu0 %v652_v53 }
  0xcf   :  { %563 = vmatprep.mubr.msk.f32.mxu0 %vm759_vm0, %v760_v18  ;;  %616 = vmatpush3.bf16.msra.mxu0 %v615_v3 }
  0xd0   :  { %617 = vmatprep.subr.bf16.mxu0 %v757_v1 }
  0xd3   :  { %619 = vmatpush3.bf16.msra.mxu0 %v618_v5 }
  0xd4   :  { %620 = vmatprep.subr.bf16.mxu0 %v757_v1 }
  0xd7   :  { %622 = vmatpush3.bf16.msra.mxu0 %v621_v8 }
  0xd8   :  { %623 = vmatprep.subr.bf16.mxu0 %v757_v1 }
  0xdb   :  { %625 = vmatpush3.bf16.msra.mxu0 %v624_v11 }
  0xdc   :  { %626 = vmatprep.subr.bf16.mxu0 %v757_v1 }
  0xdf   :  { %628 = vmatpush3.bf16.msra.mxu0 %v627_v14 }
  0xe0   :  { %629 = vmatprep.subr.bf16.mxu0 %v757_v1 }
  0xe3   :  { %631 = vmatpush3.bf16.msra.mxu0 %v630_v22 }
  0xe4   :  { %632 = vmatprep.subr.bf16.mxu0 %v757_v1 }
  0xe7   :  { %634 = vmatpush3.bf16.msra.mxu0 %v633_v25 }
  0xe8   :  { %635 = vmatprep.subr.bf16.mxu0 %v757_v1 }
  0xeb   :  { %637 = vmatpush3.bf16.msra.mxu0 %v636_v28 }
 0x1a1   :  { %v195_v16 = vpop.f32.mrb[0].mxu0 }
 0x1a2   :  { %v196_v17 = vadd.f32 %v407_v15, %v195_v16  ;;  %v495_v18 = vpop.f32.mrb[1].mxu0 }
 0x1a4   :  { %653 = vtanh.f32 %v196_v17 }
 0x1ae   :  { %v654_v19 = vpop.eup %653 }
 0x1af   :  { %529 = vmatmul.mubr.f32.vlgmr.msra.gmra.mrb[0].mxu1 %v654_v19 }
 0x282   :  { %v289_v30 = vpop.f32.mrb[0].mxu1 }
 0x283   :  { %v290_v31 = vadd.f32 %v408_v29, %v289_v30  ;;  %v530_v32 = vpop.f32.mrb[1].mxu1 }
 0x285   :  { %655 = vtanh.f32 %v290_v31 }
 0x28f   :  { %v656_v33 = vpop.eup %655 }
 0x290   :  { %564 = vmatmul.mubr.f32.vlgmr.msra.gmra.mrb[2].mxu0 %v656_v33 }
 0x363   :  { %v383_v35 = vpop.f32.mrb[2].mxu0 }
 0x364   :  { %v384_v36 = vadd.f32 %v409_v34, %v383_v35  ;;  %v565_v1 = vpop.f32.mrb[3].mxu0 }
 0x366   :  { %387 = vst [vmem:[#allocation8] sm:$0xff] %v384_v36 }
 0x367   :  { %734 = shalt.err (!%p731_p0)
}
 0x368   :  { %s735_s16 = scalar_lea.hbm %s933_s9, 128 }
 0x369   :  { %p736_p1 = scmp.ne.s32.totalorder %s933_s9, %s735_s16  ;;  %p739_p2 = scmp.lt.u32.totalorder %s735_s16, %s933_s9 }
 0x36b   :  { %p741_p3 = pnand %p739_p2, %p736_p1 }
 0x36d   :  { %744 = shalt.err (!%p741_p3)
}
 0x36e   :  { %397 = dma.vmem_to_hbm [thread:$0]  %s395_s10, 128, %s933_s9, [#allocation4]  }
 0x36f   :  { %749 = dma.done.wait [#allocation4], 128  }
 0x370   :  { %750 = vsyncadd [#allocation4], 4294967168 }
 0x371   :  { %401 = vsyncpa [#allocation3], 1 }
 0x372   :  { %402 = vsyncpa [#allocation6], 1 }
 0x373   :  { %403 = vsyncpa [#allocation4], 1 }

</bundles_post_ra>
